<compile_context>
chip_gen: v7x
topology: tpu7x:2x2x1
jax: 0.10.0
libtpu: 0.0.40
codegen_flags: <defaults>
</compile_context>

<pallas_src>
import jax
import jax.numpy as jnp
from jax.experimental import pallas as pl
from jax.experimental.pallas import tpu as pltpu


def _round_up(x: int, m: int) -> int:
    return ((x + m - 1) // m) * m


def _target_tile_edges() -> int:
    """Edges per grid step, sized so per-step DMA >> ~0.35 us step overhead."""
    try:
        kind = jax.devices()[0].device_kind.lower()
    except Exception:  # pragma: no cover - defensive, e.g. no device yet
        kind = ""
    if "v5 lite" in kind or "v5e" in kind or "v5lite" in kind:
        return 64 * 1024       # ~1 MB/step; fits v5e's 16 MiB scoped-VMEM default
    if "v7" in kind:
        return 256 * 1024      # 3.2 TB/s HBM needs >~1 us of DMA per step
    return 128 * 1024          # v6e / default: 70-85% of HBM roofline


def _edge_norm_kernel(dvec_ref, dist_ref):
    # dvec_ref : (3, R, 128) f32 — xyz on leading axis, edges dense on
    #            (sublane, lane); each component is a dense (R, 128) slab.
    # dist_ref : (R, 128) f32    — lane- and sublane-dense L2 norms.
    dx = dvec_ref[0]
    dy = dvec_ref[1]
    dz = dvec_ref[2]
    # NOTE: sqrt(0) has an undefined gradient for zero-length (self-loop)
    # edges; matches the PyTorch `.norm(dim=-1)` forward exactly, so no eps.
    dist_ref[...] = jnp.sqrt(dx * dx + dy * dy + dz * dz)


def edge_norm_pallas(dvec_dense):
    """Per-edge L2 norm of a dense (3, e_pad//128, 128) slab -> (e_pad,) f32.

    Pure VPU/EUP work on fully dense tiles; no cross-lane reduction, unmasked
    wide stores, HBM-bandwidth bound.
    """
    C, R_total, L = dvec_dense.shape
    assert C == 3 and L == 128 and R_total % 8 == 0
    e_pad = R_total * 128
    dvec_dense = dvec_dense.astype(jnp.float32)

    # Tile size: big enough that DMA time dominates the ~0.35 us/step pipeline
    # overhead, small enough that large problems spread over >=2 "parallel"
    # grid steps (megacore on v7x) and the double-buffered footprint (2-8 MB)
    # stays under every generation's default scoped-VMEM limit.
    te = min(_target_tile_edges(), max(1024, _round_up(e_pad // 2, 1024)))
    r_blk = te // 128            # multiple of 8 -> (8, 128)-aligned blocks

    dist = pl.pallas_call(
        _edge_norm_kernel,
        out_shape=jax.ShapeDtypeStruct((R_total, 128), jnp.float32),
        grid_spec=pltpu.PrefetchScalarGridSpec(
            num_scalar_prefetch=0,
            grid=(pl.cdiv(R_total, r_blk),),
            in_specs=[pl.BlockSpec((3, r_blk, 128), lambda e: (0, e, 0))],
            out_specs=pl.BlockSpec((r_blk, 128), lambda e: (e, 0)),
        ),
        compiler_params=pltpu.CompilerParams(
            dimension_semantics=("parallel",)
        ),
    )(dvec_dense)
    return dist.reshape(e_pad)


def _generate_graph_impl(pos, edge_index, batch, num_graphs):
    """JAX equivalent of BaseModel.generate_graph (use_pbc=False, otf_graph=False).

    pos        : (N, 3) float32 atom positions
    edge_index : (2, E) int32, row 0 = source j, row 1 = target i
    batch      : (N,)  int32 graph id per atom
    """
    j = edge_index[0]
    i = edge_index[1]
    E = edge_index.shape[1]

    # Pad the cheap int32 index vectors (4 B/edge) instead of the f32 dvec
    # slab.  Pad value 0 -> padded tail computes pos[0] - pos[0] = 0, which is
    # numerically harmless and sliced off below.
    e_pad = _round_up(max(E, 1), 1024)
    pad = e_pad - E
    j_pad = jnp.pad(j, (0, pad))
    i_pad = jnp.pad(i, (0, pad))

    pos32 = pos.astype(jnp.float32)

    # distance_vec produced directly in its returned (E, 3) row layout by a
    # row gather fused with the subtraction — no standalone (3,E)->(E,3)
    # transpose pass over HBM.
    # NOTE: jnp.take clamps out-of-range indices (PyTorch would raise).
    dvec_rows = jnp.take(pos32, j_pad, axis=0) - jnp.take(pos32, i_pad, axis=0)
    distance_vec = dvec_rows[:E].astype(pos.dtype)

    # Dense (3, e_pad//128, 128) slab for the Pallas norm kernel, produced by a
    # column gather fused with the subtraction (the kernel then only touches
    # 16 B/edge of HBM: 12 read + 4 write).
    pos_t = pos32.T                                                   # (3, N)
    dvec_dense = (jnp.take(pos_t, j_pad, axis=1)
                  - jnp.take(pos_t, i_pad, axis=1)).reshape(3, e_pad // 128, 128)

    # Hot path in Pallas: dense per-edge L2 norm.
    edge_dist = edge_norm_pallas(dvec_dense)[:E].astype(pos.dtype)    # (E,)

    cell_offsets = jnp.zeros((E, 3), dtype=pos.dtype)
    cell_offset_distances = jnp.zeros((E, 3), dtype=pos.dtype)

    # compute_neighbors: number of edges per graph (by target node's graph id).
    # TODO(synk): data-dependent scatter/segment count has no clean static-tile
    # Pallas equivalent at this size; done with jnp segment_sum glue.
    edge_graph = jnp.take(batch, i)
    neighbors = jax.ops.segment_sum(
        jnp.ones((E,), dtype=jnp.int32), edge_graph, num_segments=num_graphs
    )

    return (edge_index, edge_dist, distance_vec, cell_offsets,
            cell_offset_distances, neighbors)


generate_graph = jax.jit(_generate_graph_impl, static_argnames="num_graphs")


class BaseModel:
    """Minimal JAX port: forward is NotImplemented, generate_graph is the compute."""

    def __init__(self, num_atoms=None, bond_feat_dim=None, num_targets=None):
        self.num_atoms = num_atoms
        self.bond_feat_dim = bond_feat_dim
        self.num_targets = num_targets

    def forward(self, data):
        raise NotImplementedError

    def generate_graph(self, pos, edge_index, batch, num_graphs):
        return generate_graph(pos, edge_index, batch, num_graphs=num_graphs)

    @property
    def num_params(self):
        return 0  # BaseModel defines no parameters


if __name__ == "__main__":
    key = jax.random.PRNGKey(0)
    k_pos, k_edge = jax.random.split(key)

    N = 16          # atoms
    E = 64          # edges
    num_graphs = 2  # graphs in the batch

    pos = jax.random.normal(k_pos, (N, 3), dtype=jnp.float32)
    edge_index = jax.random.randint(k_edge, (2, E), 0, N, dtype=jnp.int32)
    batch = jnp.concatenate(
        [jnp.zeros((N // 2,), jnp.int32), jnp.ones((N - N // 2,), jnp.int32)]
    )

    model = BaseModel(num_atoms=N, bond_feat_dim=8, num_targets=1)
    (ei, edge_dist, distance_vec, cell_offsets,
     cell_offset_dist, neighbors) = model.generate_graph(pos, edge_index, batch, num_graphs)
    jax.block_until_ready((edge_dist, distance_vec, neighbors))

    # Correctness check against a pure-JAX reference.
    ref_dvec = pos[edge_index[0]] - pos[edge_index[1]]
    ref_dist = jnp.linalg.norm(ref_dvec, axis=-1)
    assert jnp.allclose(distance_vec, ref_dvec, atol=1e-6)
    assert jnp.allclose(edge_dist, ref_dist, atol=1e-6)
    assert edge_dist.shape == (E,)
    assert distance_vec.shape == (E, 3)
    assert cell_offsets.shape == (E, 3) and cell_offset_dist.shape == (E, 3)
    assert int(neighbors.sum()) == E

    print("KERNEL_OK")
</pallas_src>

<mosaic_0001>
module attributes {stable_mosaic.version = 11 : i64} {
  func.func private @main(%arg0: i32) attributes {dimension_semantics = [#tpu.dimension_semantics<core_parallel>], iteration_bounds = array<i64: 2>, tpu.core_type = #tpu.core_type<sc_scalar_subcore>, window_params = []} {
    return
  }
}

module attributes {stable_mosaic.version = 11 : i64} {
  func.func private @main(%arg0: i32) attributes {dimension_semantics = [#tpu.dimension_semantics<core_parallel>], iteration_bounds = array<i64: 2>, tpu.core_type = #tpu.core_type<sc_scalar_subcore>, window_params = []} {
    return
  }
}

module attributes {stable_mosaic.version = 11 : i64} {
  func.func @_edge_norm_kernel(%arg0: i32, %arg1: memref<3x8x128xf32, #tpu.memory_space<vmem>>, %arg2: memref<8x128xf32, #tpu.memory_space<vmem>>) attributes {dimension_semantics = [#tpu.dimension_semantics<parallel>], iteration_bounds = array<i64: 1>, scalar_prefetch = 0 : i64, scratch_operands = 0 : i64, tpu.core_type = #tpu.core_type<tc>, window_params = [{transform_indices = @transform_0, window_bounds = array<i64: 3, 8, 128>}, {transform_indices = @transform_1, window_bounds = array<i64: 8, 128>}]} {
    %c0 = arith.constant 0 : index
    %c0_0 = arith.constant 0 : index
    %c0_1 = arith.constant 0 : index
    %0 = vector.load %arg1[%c0, %c0_0, %c0_1] : memref<3x8x128xf32, #tpu.memory_space<vmem>>, vector<1x8x128xf32>
    %1 = vector.shape_cast %0 : vector<1x8x128xf32> to vector<8x128xf32>
    %c1 = arith.constant 1 : index
    %c0_2 = arith.constant 0 : index
    %c0_3 = arith.constant 0 : index
    %2 = vector.load %arg1[%c1, %c0_2, %c0_3] : memref<3x8x128xf32, #tpu.memory_space<vmem>>, vector<1x8x128xf32>
    %3 = vector.shape_cast %2 : vector<1x8x128xf32> to vector<8x128xf32>
    %c2 = arith.constant 2 : index
    %c0_4 = arith.constant 0 : index
    %c0_5 = arith.constant 0 : index
    %4 = vector.load %arg1[%c2, %c0_4, %c0_5] : memref<3x8x128xf32, #tpu.memory_space<vmem>>, vector<1x8x128xf32>
    %5 = vector.shape_cast %4 : vector<1x8x128xf32> to vector<8x128xf32>
    %6 = arith.mulf %1, %1 : vector<8x128xf32>
    %7 = arith.mulf %3, %3 : vector<8x128xf32>
    %8 = arith.addf %6, %7 : vector<8x128xf32>
    %9 = arith.mulf %5, %5 : vector<8x128xf32>
    %10 = arith.addf %8, %9 : vector<8x128xf32>
    %11 = math.sqrt %10 : vector<8x128xf32>
    %c0_6 = arith.constant 0 : index
    %c0_7 = arith.constant 0 : index
    %12 = vector.load %arg2[%c0_6, %c0_7] : memref<8x128xf32, #tpu.memory_space<vmem>>, vector<8x128xf32>
    tpu.vector_store %arg2[%c0_6, %c0_7], %11 {strides = array<i32>} : memref<8x128xf32, #tpu.memory_space<vmem>>, vector<8x128xf32>,
    return
  }
  func.func @transform_0(%arg0: i32) -> (i32, i32, i32) {
    %c0_i32 = arith.constant 0 : i32
    %c0_i32_0 = arith.constant 0 : i32
    %c0_i32_1 = arith.constant 0 : i32
    return %c0_i32, %arg0, %c0_i32_0 : i32, i32, i32
  }
  func.func @transform_1(%arg0: i32) -> (i32, i32) {
    %c0_i32 = arith.constant 0 : i32
    %c0_i32_0 = arith.constant 0 : i32
    return %arg0, %c0_i32 : i32, i32
  }
}

</mosaic_0001>

<bundles_post_ra>
// kernel: _generate_graph_impl.1
= control target key start
LH: loop header
LB: loop body
LE: loop exit
PB: predicated region body
PF: predicated region fallthrough
CT: control target
= control target key end

     0   :  { %s56_s0 = inlined_call_operand.vmem [shape: f32[3,8,128], index: 0, kind: input, shape index: {}]   ;;  %s57_s1 = inlined_call_operand.vmem [shape: f32[8,128], index: 1, kind: output, shape index: {}]  }
   0x1   :  { %v8_v0 = vld [vmem:[%s56_s0] sm:$0xff]  ;;  %v30_v1 = vld [vmem:[%s56_s0 + $0x8] sm:$0xff]  ;;  %v31_v2 = vld [vmem:[%s56_s0 + $0x10] sm:$0xff] }
   0x2   :  { %v13_v3 = vmul.f32 %v8_v0, %v8_v0  ;;  %v14_v4 = vmul.f32 %v30_v1, %v30_v1  ;;  %v16_v5 = vmul.f32 %v31_v2, %v31_v2 }
   0x4   :  { %v15_v6 = vadd.f32 %v14_v4, %v13_v3 }
   0x6   :  { %v17_v7 = vadd.f32 %v16_v5, %v15_v6 }
   0x8   :  { %32 = vrsqrt.f32 %v17_v7  ;;  %vm20_vm0 = vcmp.eq.f32.partialorder %v17_v7, inf  ;;  %v23_v9 = vand.u32 2147483648, %v17_v7  ;;  %vm22_vm1 = vcmp.eq.f32.partialorder %v17_v7, 0.0 }
  0x12   :  { %v33_v8 = vpop.eup %32 }
  0x13   :  { %v19_v10 = vmul.f32 %v33_v8, %v17_v7 }
  0x15   :  { %v21_v11 = vsel %vm20_vm0, %v17_v7, %v19_v10 }
  0x16   :  { %v24_v12 = vsel %vm22_vm1, %v23_v9, %v21_v11 }
  0x17   :  { %25 = vst [vmem:[%s57_s1] sm:$0xff] %v24_v12 }

</bundles_post_ra>
